<compile_context>
chip_gen: v5e
topology: v5e:2x2
jax: 0.10.0
libtpu: 0.0.40
codegen_flags: <defaults>
</compile_context>

<pallas_src>
import jax
import jax.numpy as jnp
from jax.experimental import pallas as pl
from jax.experimental.pallas import tpu as pltpu


def _tversky_tp_kernel(logits_ref, labels_ref, tp_ref):
    j = pl.program_id(2)

    # zero the resident per-(n, core) accumulator at the start of its sweep
    @pl.when(j == 0)
    def _():
        tp_ref[...] = jnp.zeros_like(tp_ref)

    x = logits_ref[0].astype(jnp.float32)      # (C, tn): channels x pixels
    lab = labels_ref[0]                        # (1, tn) int32 (-1 on padded pixels)

    # softmax over channels (sublane axis); only the true-class probability is
    # needed:  p_true = exp(x[label] - m) / sum_c exp(x[c] - m)
    m = jnp.max(x, axis=0, keepdims=True)      # (1, tn)
    e = jnp.exp(x - m)                         # (C, tn)
    s = jnp.sum(e, axis=0, keepdims=True)      # (1, tn)

    c_iota = jax.lax.broadcasted_iota(jnp.int32, x.shape, 0)          # (C, tn)
    e_true = jnp.sum(jnp.where(c_iota == lab, e, 0.0),
                     axis=0, keepdims=True)                           # (1, tn)

    # padded pixels (label == -1) give e_true == 0 and contribute nothing.
    # exact divide kept (instead of approx reciprocal) to stay within 1e-5 tol.
    tp_ref[...] += jnp.sum(e_true / s)


def tversky_loss(inputs, targets, smooth=1.0, alpha=0.9, beta=0.1,
                 num_classes=20, tn=8192):
    """inputs: (N, C, H, W) float logits.  targets: (N, 1, H, W) int labels."""
    N, C, H, W = inputs.shape
    assert C == num_classes, "channel dim must equal num_classes"
    HW = H * W
    M = N * HW                                 # number of valid pixels

    # NCHW consumed natively: (N, C, HW) logits, (N, 1, HW) labels — no transpose.
    logits = inputs.reshape(N, C, HW)
    labels = targets.reshape(N, 1, HW).astype(jnp.int32)

    ncores = 2                                           # 2-way split -> v7x megacore
    tn = max(128, min(tn, ((HW + 127) // 128) * 128))    # lane tile, multiple of 128
    nb = (HW + tn - 1) // tn
    nb = ((nb + ncores - 1) // ncores) * ncores          # divisible by the core split
    HW_pad = nb * tn
    if HW_pad != HW:
        logits = jnp.pad(logits, ((0, 0), (0, 0), (0, HW_pad - HW)))
        labels = jnp.pad(labels, ((0, 0), (0, 0), (0, HW_pad - HW)),
                         constant_values=-1)             # -1 => matches no class
    nbh = nb // ncores

    tp_parts = pl.pallas_call(
        _tversky_tp_kernel,
        out_shape=jax.ShapeDtypeStruct((N, ncores, 1, 1), jnp.float32),
        grid_spec=pltpu.PrefetchScalarGridSpec(
            num_scalar_prefetch=0,
            grid=(N, ncores, nbh),
            in_specs=[
                pl.BlockSpec((1, C, tn), lambda n, c, j: (n, 0, c * nbh + j)),
                pl.BlockSpec((1, 1, tn), lambda n, c, j: (n, 0, c * nbh + j)),
            ],
            out_specs=pl.BlockSpec((1, 1, 1, 1), lambda n, c, j: (n, c, 0, 0)),
        ),
        compiler_params=pltpu.CompilerParams(
            dimension_semantics=("parallel", "parallel", "arbitrary")),
    )(logits, labels)

    tp = jnp.sum(tp_parts)
    # softmax and one-hot each sum to 1 per (valid) pixel, hence
    #   FP = sum(probs) - TP = M - TP,   FN = sum(onehot) - TP = M - TP
    fp = jnp.float32(M) - tp
    fn = fp
    tversky = (tp + smooth) / (tp + alpha * fp + beta * fn + smooth)
    return 1.0 - tversky


def _reference(inputs, targets, smooth=1.0, alpha=0.9, beta=0.1, num_classes=20):
    onehot = jax.nn.one_hot(targets[:, 0], num_classes, dtype=jnp.float32)  # (N,H,W,C)
    onehot = jnp.transpose(onehot, (0, 3, 1, 2))                            # (N,C,H,W)
    probs = jax.nn.softmax(inputs, axis=1)
    tp = jnp.sum(probs * onehot)
    fp = jnp.sum((1.0 - onehot) * probs)
    fn = jnp.sum(onehot * (1.0 - probs))
    return 1.0 - (tp + smooth) / (tp + alpha * fp + beta * fn + smooth)


if __name__ == "__main__":
    key = jax.random.PRNGKey(0)
    k_logits, k_labels = jax.random.split(key)

    N, C, H, W = 2, 20, 16, 16   # num_classes = 20 (module default)
    inputs = jax.random.normal(k_logits, (N, C, H, W), dtype=jnp.float32)
    targets = jax.random.randint(k_labels, (N, 1, H, W), 0, C, dtype=jnp.int32)

    loss = tversky_loss(inputs, targets)
    loss = jax.block_until_ready(loss)

    ref = _reference(inputs, targets)
    assert jnp.allclose(loss, ref, rtol=1e-5, atol=1e-5), (loss, ref)

    print("KERNEL_OK")
</pallas_src>

<mosaic_0001>
module attributes {stable_mosaic.version = 11 : i64} {
  func.func @_tversky_tp_kernel(%arg0: i32, %arg1: i32, %arg2: i32, %arg3: memref<1x20x256xf32, #tpu.memory_space<vmem>>, %arg4: memref<1x1x256xi32, #tpu.memory_space<vmem>>, %arg5: memref<1x1x1x1xf32, #tpu.memory_space<vmem>>) attributes {dimension_semantics = [#tpu.dimension_semantics<parallel>, #tpu.dimension_semantics<parallel>, #tpu.dimension_semantics<arbitrary>], iteration_bounds = array<i64: 2, 2, 1>, scalar_prefetch = 0 : i64, scratch_operands = 0 : i64, tpu.core_type = #tpu.core_type<tc>, window_params = [{transform_indices = @transform_0, window_bounds = array<i64: 1, 20, 256>}, {transform_indices = @transform_1, window_bounds = array<i64: 1, 1, 256>}, {transform_indices = @transform_2, window_bounds = array<i64: 1, 1, 1, 1>}]} {
    %c0_i32 = arith.constant 0 : i32
    %0 = arith.cmpi eq, %arg2, %c0_i32 : i32
    %1 = arith.extui %0 : i1 to i32
    %c0_i32_0 = arith.constant 0 : i32
    %2 = arith.cmpi ne, %1, %c0_i32_0 : i32
    scf.if %2 {
      %cst_18 = arith.constant 0.000000e+00 : f32
      %30 = vector.broadcast %cst_18 : f32 to vector<1x1x1x1xf32>
      %c0_19 = arith.constant 0 : index
      %c0_20 = arith.constant 0 : index
      %c0_21 = arith.constant 0 : index
      %c0_22 = arith.constant 0 : index
      %31 = vector.load %arg5[%c0_19, %c0_20, %c0_21, %c0_22] : memref<1x1x1x1xf32, #tpu.memory_space<vmem>>, vector<1x1x1x1xf32>
      tpu.vector_store %arg5[%c0_19, %c0_20, %c0_21, %c0_22], %30 {strides = array<i32>} : memref<1x1x1x1xf32, #tpu.memory_space<vmem>>, vector<1x1x1x1xf32>,
    } else {
    }
    %c0 = arith.constant 0 : index
    %c0_1 = arith.constant 0 : index
    %c0_2 = arith.constant 0 : index
    %3 = vector.load %arg3[%c0, %c0_1, %c0_2] : memref<1x20x256xf32, #tpu.memory_space<vmem>>, vector<1x20x256xf32>
    %4 = vector.shape_cast %3 : vector<1x20x256xf32> to vector<20x256xf32>
    %c0_3 = arith.constant 0 : index
    %c0_4 = arith.constant 0 : index
    %c0_5 = arith.constant 0 : index
    %5 = vector.load %arg4[%c0_3, %c0_4, %c0_5] : memref<1x1x256xi32, #tpu.memory_space<vmem>>, vector<1x1x256xi32>
    %6 = vector.shape_cast %5 : vector<1x1x256xi32> to vector<1x256xi32>
    %cst = arith.constant dense<0xFF800000> : vector<256xf32>
    %7 = vector.multi_reduction <maximumf>, %4, %cst [0] : vector<20x256xf32> to vector<256xf32>
    %8 = vector.shape_cast %7 : vector<256xf32> to vector<1x256xf32>
    %9 = vector.broadcast %8 : vector<1x256xf32> to vector<20x256xf32>
    %10 = arith.subf %4, %9 : vector<20x256xf32>
    %11 = math.exp %10 : vector<20x256xf32>
    %cst_6 = arith.constant dense<0.000000e+00> : vector<256xf32>
    %12 = vector.multi_reduction <add>, %11, %cst_6 [0] : vector<20x256xf32> to vector<256xf32>
    %13 = vector.shape_cast %12 : vector<256xf32> to vector<1x256xf32>
    %14 = tpu.iota {dimensions = array<i32: 0>} : vector<20x256xi32>
    %15 = vector.broadcast %6 : vector<1x256xi32> to vector<20x256xi32>
    %16 = arith.cmpi eq, %14, %15 : vector<20x256xi32>
    %cst_7 = arith.constant 0.000000e+00 : f32
    %17 = vector.broadcast %cst_7 : f32 to vector<20x256xf32>
    %18 = arith.select %16, %11, %17 : vector<20x256xi1>, vector<20x256xf32>
    %cst_8 = arith.constant dense<0.000000e+00> : vector<256xf32>
    %19 = vector.multi_reduction <add>, %18, %cst_8 [0] : vector<20x256xf32> to vector<256xf32>
    %20 = vector.shape_cast %19 : vector<256xf32> to vector<1x256xf32>
    %c0_9 = arith.constant 0 : index
    %c0_10 = arith.constant 0 : index
    %c0_11 = arith.constant 0 : index
    %c0_12 = arith.constant 0 : index
    %21 = vector.load %arg5[%c0_9, %c0_10, %c0_11, %c0_12] : memref<1x1x1x1xf32, #tpu.memory_space<vmem>>, vector<1x1x1x1xf32>
    %22 = arith.divf %20, %13 : vector<1x256xf32>
    %23 = vector.shape_cast %22 : vector<1x256xf32> to vector<1x1x256xf32>
    %cst_13 = arith.constant dense<0.000000e+00> : vector<1xf32>
    %24 = vector.multi_reduction <add>, %23, %cst_13 [1, 2] : vector<1x1x256xf32> to vector<1xf32>
    %25 = vector.shape_cast %24 : vector<1xf32> to vector<1x1x1xf32>
    %26 = vector.extract %25[0, 0, 0] : f32 from vector<1x1x1xf32>
    %27 = vector.broadcast %26 : f32 to vector<1x1x1x1xf32>
    %28 = arith.addf %21, %27 : vector<1x1x1x1xf32>
    %c0_14 = arith.constant 0 : index
    %c0_15 = arith.constant 0 : index
    %c0_16 = arith.constant 0 : index
    %c0_17 = arith.constant 0 : index
    %29 = vector.load %arg5[%c0_14, %c0_15, %c0_16, %c0_17] : memref<1x1x1x1xf32, #tpu.memory_space<vmem>>, vector<1x1x1x1xf32>
    tpu.vector_store %arg5[%c0_14, %c0_15, %c0_16, %c0_17], %28 {strides = array<i32>} : memref<1x1x1x1xf32, #tpu.memory_space<vmem>>, vector<1x1x1x1xf32>,
    return
  }
  func.func @transform_0(%arg0: i32, %arg1: i32, %arg2: i32) -> (i32, i32, i32) {
    %c1_i32 = arith.constant 1 : i32
    %0 = arith.muli %arg1, %c1_i32 : i32
    %1 = arith.addi %0, %arg2 : i32
    %c0_i32 = arith.constant 0 : i32
    %c0_i32_0 = arith.constant 0 : i32
    return %arg0, %c0_i32, %1 : i32, i32, i32
  }
  func.func @transform_1(%arg0: i32, %arg1: i32, %arg2: i32) -> (i32, i32, i32) {
    %c1_i32 = arith.constant 1 : i32
    %0 = arith.muli %arg1, %c1_i32 : i32
    %1 = arith.addi %0, %arg2 : i32
    %c0_i32 = arith.constant 0 : i32
    %c0_i32_0 = arith.constant 0 : i32
    return %arg0, %c0_i32, %1 : i32, i32, i32
  }
  func.func @transform_2(%arg0: i32, %arg1: i32, %arg2: i32) -> (i32, i32, i32, i32) {
    %c0_i32 = arith.constant 0 : i32
    %c0_i32_0 = arith.constant 0 : i32
    %c0_i32_1 = arith.constant 0 : i32
    return %arg0, %arg1, %c0_i32, %c0_i32_0 : i32, i32, i32, i32
  }
}

</mosaic_0001>

<bundles_post_ra>
// kernel: tpu_custom_call.1
= control target key start
LH: loop header
LB: loop body
LE: loop exit
PB: predicated region body
PF: predicated region fallthrough
CT: control target
= control target key end

     0   :  { %s664_s9 = smov 0   ;;  %s666_s10 = smov 0   ;;  %s769_s0 = inlined_call_operand.vmem [shape: f32[2,20,512], index: 0, kind: input, shape index: {}]   ;;  %s770_s1 = inlined_call_operand.vmem [shape: s32[2,1,512], index: 1, kind: input, shape index: {}]   ;;  %s771_s2 = inlined_call_operand.vmem [shape: f32[2,2,1,1], index: 2, kind: output, shape index: {}]  }
   0x1   :  { %s668_s11 = smov 0   ;;  %s670_s12 = smov 0  }
   0x2   :  { %s672_s13 = smov 0   ;;  %s674_s14 = smov 0  }
   0x3   :  { %s676_s15 = smov 0  }
   0x4 LB: > { %s27_s16 = sadd.s32 1, %s638_s13  ;;  %s31_s17 = sadd.s32 1, %s642_s14  ;;  %s646_s15 = sphi %s676_s15, %s12_s15   ;;  %s642_s14 = sphi %s674_s14, %s777_s14   ;;  %s638_s13 = sphi %s672_s13, %s776_s13   ;;  %s634_s12 = sphi %s670_s12, %s775_s12   ;;  %s630_s11 = sphi %s668_s11, %s774_s11   ;;  %s626_s10 = sphi %s666_s10, %s773_s10   ;;  %s622_s9 = sphi %s664_s9, %s772_s9  }
   0x5   : > { %p29_p0 = scmp.ge.s32.totalorder %s27_s16, 2  ;;  %p49_p1 = scmp.ne.s32.totalorder %s626_s10, %s622_s9 }
   0x6   : > { %p50_p2 = scmp.eq.s32.totalorder %s646_s15, 0  ;;  %s42_s21 = sadd.s32 1, %s626_s10 }
   0x7   : > { %s779_s16 = smov (%p29_p0, %s27_s16), 0  ;;  %s781_s17 = smov (!%p29_p0, %s31_s17), %s642_s14 }
   0x8   : > { %p51_p3 = por %p50_p2, %p49_p1  ;;  %p33_p4 = scmp.ge.s32.totalorder %s781_s17, 2 }
   0x9   : > { %s38_s18 = ssub.s32 %s638_s13, %s779_s16  ;;  %p505_p6 = scmp.ge.s32.totalorder %s646_s15, 4 }
   0xa   : > { %s783_s17 = smov (%p33_p4, %s781_s17), 0 }
   0xb   : > { %s37_s19 = ssub.s32 %s642_s14, %s783_s17  ;;  %133 = sbr.rel (%p505_p6) target bundleno = 30 (0x1e), region = 16 }
   0xc   : > { %s39_s20 = sor.u32 %s38_s18, %s37_s19 }
   0xd   : > { %p40_p5 = scmp.eq.s32.totalorder %s39_s20, 0 }
   0xf   : > { %s715_s22 = scalar_select %p40_p5, %s626_s10, %s42_s21  }
  0x10   : > { %136 = sbr.rel (!%p51_p3) target bundleno = 30 (0x1e), region = 20  ;;  %s138_s23 = sand.u32 (%p51_p3), 1, %s626_s10  }
  0x11   : > { %s514_s24 = smul.u32 (%p51_p3), 48, %s138_s23  ;;  %s506_s25 = sshll.u32 (%p51_p3), %s638_s13, 1 }
  0x12   : > { %s515_s26 = smul.u32 (%p51_p3), 12, %s642_s14 }
  0x13   : > { %s140_s4 = scalar_lea.vmem (%p51_p3), [#allocation2], %s514_s24 }
  0x14   : > { %s144_s27 = sadd.s32 (%p51_p3), %s515_s26, %s506_s25 }
  0x15   : > { %s507_s28 = sshll.u32 %s144_s27, 3 }
  0x16   : > { %s146_s3 = scalar_lea.vmem %s769_s0, %s507_s28 }
  0x17   : > { %v159_v0 = vld [vmem:[%s146_s3] sm:$0xff]  ;;  %v161_v1 = vld [vmem:[%s146_s3 + $0x8] sm:$0xff] }
  0x18   : > { %v163_v2 = vld [vmem:[%s146_s3 + $0x20] sm:$0xff]  ;;  %160 = vst [vmem:[%s140_s4] sm:$0xff] %v159_v0  ;;  %v165_v3 = vld [vmem:[%s146_s3 + $0x28] sm:$0xff] }
  0x19   : > { %162 = vst [vmem:[%s140_s4 + $0x8] sm:$0xff] %v161_v1  ;;  %v167_v4 = vld [vmem:[%s146_s3 + $0x40] sm:$0xff]  ;;  %v169_v5 = vld [vmem:[%s146_s3 + $0x48] sm:$0xff] }
  0x1a   : > { %164 = vst [vmem:[%s140_s4 + $0x10] sm:$0xff] %v163_v2 }
  0x1b   : > { %166 = vst [vmem:[%s140_s4 + $0x18] sm:$0xff] %v165_v3 }
  0x1c   : > { %168 = vst [vmem:[%s140_s4 + $0x20] sm:$0xff] %v167_v4 }
  0x1d   : > { %170 = vst [vmem:[%s140_s4 + $0x28] sm:$0xff] %v169_v5 }
  0x1e PF: > { %p508_p7 = scmp.ge.s32.totalorder %s646_s15, 1  ;;  %p189_p8 = scmp.lt.s32.totalorder %s646_s15, 5 }
  0x20   : > { %p190_p9 = pnand %p508_p7, %p189_p8 }
  0x21   : > { %s196_s5 = sand.u32 (!%p190_p9), 1, %s622_s9   ;;  %s509_s8 = sshll.u32 (!%p190_p9), %s630_s11, 1 }
  0x22   : > { %193 = sbr.rel (%p190_p9) target bundleno = 293 (0x125), region = 47  ;;  %p232_p10 = scmp.lt.s32.totalorder (!%p190_p9), %s634_s12, 1 }
  0x23   : > { %s516_s6 = smul.u32 (!%p190_p9), 48, %s196_s5  ;;  %p234_p11 = scmp.lt.s32.totalorder (!%p190_p9), %s509_s8, 3 }
  0x24   : > { %p243_p12 = scmp.lt.s32.totalorder (!%p190_p9), %s630_s11, 1 }
  0x25   : > { %s198_s7 = scalar_lea.vmem (!%p190_p9), [#allocation2], %s516_s6 }
  0x27   : > { %vm261_vm0 = vcmask 1043456   ;;  %v254_v6 = vld [vmem:[%s198_s7] sm:$0xff]  ;;  %v255_v7 = vld [vmem:[%s198_s7 + $0x8] sm:$0xff]  ;;  %v256_v10 = vld [vmem:[%s198_s7 + $0x10] sm:$0xff]  ;;  %s785_s12 = smov (!%p232_p10, %s634_s12), 1  ;;  %s787_s8 = smov (!%p234_p11, %s509_s8), 3  ;;  %v316_v28 = vlaneseq }
  0x28   : > { %v258_v8 = vld [vmem:[%s198_s7 + $0x20] sm:$0xf]  ;;  %v259_v9 = vld [vmem:[%s198_s7 + $0x28] sm:$0xf]  ;;  %v257_v11 = vld [vmem:[%s198_s7 + $0x18] sm:$0xff]  ;;  %s510_s9 = sshll.u32 %s785_s12, 2 }
  0x29   : > { %v262_v12 = vsel %vm261_vm0, %v258_v8, -inf  ;;  %v271_v13 = vsel %vm261_vm0, %v259_v9, -inf  ;;  %s237_s18 = sadd.s32 %s510_s9, %s787_s8  ;;  %v317_v38 = vshrl.u32 %v316_v28, 7  ;;  %vm383_vm15 = vcmask 1040384   ;;  %s789_s11 = smov (!%p243_p12, %s630_s11), 1 }
  0x2a   : > { %v263_v14 = vmax.f32 %v254_v6, %v262_v12  ;;  %v272_v15 = vmax.f32 %v255_v7, %v271_v13  ;;  %s238_s21 = scalar_lea.vmem %s770_s1, %s237_s18  ;;  %s511_s23 = sshll.u32 %s785_s12, 1 }
  0x2b   : > { %v260_v35 = vld [vmem:[%s238_s21] sm:$0x3]  ;;  %v318_v47 = vadd.s32 8, %v317_v38  ;;  %v319_v48 = vadd.s32 16, %v317_v38  ;;  %s246_s24 = sadd.s32 %s511_s23, %s789_s11 }
  0x2c   : > { %v264_v16 = vmax.f32 %v263_v14, %v256_v10  ;;  %v273_v17 = vmax.f32 %v272_v15, %v257_v11  ;;  %v320_v44 = vperm.slane %v260_v35, 0  ;;  %v321_v46 = vperm.slane %v260_v35, 1  ;;  %s247_s27 = scalar_lea.vmem %s771_s2, %s246_s24 }
  0x2e   : > { %v265_v18 = vrot.slane %v264_v16, 4  ;;  %v274_v19 = vrot.slane %v273_v17, 4  ;;  %vm322_vm1 = vcmp.eq.s32.totalorder %v317_v38, %v320_v44  ;;  %vm323_vm2 = vcmp.eq.s32.totalorder %v317_v38, %v321_v46 }
  0x2f   : > { %vm324_vm3 = vcmp.eq.s32.totalorder %v318_v47, %v320_v44  ;;  %vm325_vm4 = vcmp.eq.s32.totalorder %v318_v47, %v321_v46  ;;  %vm326_vm5 = vcmp.eq.s32.totalorder %v319_v48, %v320_v44  ;;  %vm327_vm6 = vcmp.eq.s32.totalorder %v319_v48, %v321_v46 }
  0x30   : > { %v266_v20 = vmax.f32 %v264_v16, %v265_v18  ;;  %v275_v21 = vmax.f32 %v273_v17, %v274_v19 }
  0x32   : > { %v267_v22 = vrot.slane %v266_v20, 2  ;;  %v276_v23 = vrot.slane %v275_v21, 2 }
  0x34   : > { %v268_v24 = vmax.f32 %v266_v20, %v267_v22  ;;  %v277_v25 = vmax.f32 %v275_v21, %v276_v23 }
  0x36   : > { %v269_v26 = vrot.slane %v268_v24, 1  ;;  %v278_v27 = vrot.slane %v277_v25, 1 }
  0x38   : > { %v270_v29 = vmax.f32 %v268_v24, %v269_v26  ;;  %v279_v30 = vmax.f32 %v277_v25, %v278_v27 }
  0x3a   : > { %v280_v31 = vsub.f32 %v254_v6, %v270_v29  ;;  %v281_v32 = vsub.f32 %v255_v7, %v279_v30  ;;  %v282_v33 = vsub.f32 %v256_v10, %v270_v29  ;;  %v283_v34 = vsub.f32 %v257_v11, %v279_v30 }
  0x3b   : > { %v284_v36 = vsub.f32 %v258_v8, %v270_v29  ;;  %v285_v37 = vsub.f32 %v259_v9, %v279_v30 }
  0x3c   : > { %v286_v39 = vmul.f32 1.442695, %v280_v31  ;;  %v288_v40 = vmul.f32 1.442695, %v281_v32  ;;  %v290_v41 = vmul.f32 1.442695, %v282_v33 }
  0x3d   : > { %v292_v42 = vmul.f32 1.442695, %v283_v34  ;;  %v294_v43 = vmul.f32 1.442695, %v284_v36  ;;  %v296_v45 = vmul.f32 1.442695, %v285_v37 }
  0x3e   : > { %576 = vpow2.f32 %v286_v39 }
  0x3f   : > { %578 = vpow2.f32 %v288_v40 }
  0x40   : > { %580 = vpow2.f32 %v290_v41 }
  0x41   : > { %582 = vpow2.f32 %v292_v42 }
  0x42   : > { %584 = vpow2.f32 %v294_v43 }
  0x43   : > { %586 = vpow2.f32 %v296_v45 }
  0x44   : > { %v577_v49 = vpop.eup %576 }
  0x45   : > { %v579_v50 = vpop.eup %578  ;;  %v328_v51 = vsel %vm322_vm1, %v577_v49, 0.0 }
  0x46   : > { %v581_v52 = vpop.eup %580  ;;  %v329_v53 = vsel %vm323_vm2, %v579_v50, 0.0 }
  0x47   : > { %v583_v54 = vpop.eup %582  ;;  %v298_v55 = vadd.f32 %v581_v52, %v577_v49  ;;  %v330_v56 = vsel %vm324_vm3, %v581_v52, 0.0 }
  0x48   : > { %v585_v57 = vpop.eup %584  ;;  %v307_v58 = vadd.f32 %v583_v54, %v579_v50  ;;  %v331_v59 = vsel %vm325_vm4, %v583_v54, 0.0  ;;  %v334_v60 = vadd.f32 %v330_v56, %v328_v51 }
  0x49   : > { %v587_v61 = vpop.eup %586  ;;  %v299_v62 = vsel %vm261_vm0, %v585_v57, 0.0  ;;  %v332_v63 = vsel %vm326_vm5, %v585_v57, 0.0  ;;  %v343_v0 = vadd.f32 %v331_v59, %v329_v53 }
  0x4a   : > { %v300_v1 = vadd.f32 %v299_v62, %v298_v55  ;;  %v308_v2 = vsel %vm261_vm0, %v587_v61, 0.0  ;;  %v333_v3 = vsel %vm327_vm6, %v587_v61, 0.0  ;;  %v335_v4 = vsel %vm261_vm0, %v332_v63, 0.0 }
  0x4b   : > { %v309_v5 = vadd.f32 %v308_v2, %v307_v58  ;;  %v336_v6 = vadd.f32 %v335_v4, %v334_v60  ;;  %v344_v7 = vsel %vm261_vm0, %v333_v3, 0.0  ;;  %vm252_vm0 = vcmask 0  }
  0x4c   : > { %v301_v8 = vrot.slane %v300_v1, 4  ;;  %v345_v9 = vadd.f32 %v344_v7, %v343_v0  ;;  %v648_v58 = vmov 0.0  }
  0x4d   : > { %v310_v10 = vrot.slane %v309_v5, 4  ;;  %v337_v13 = vrot.slane %v336_v6, 4  ;;  %253 = vst.msk [vmem:[%s247_s27] sm:$0x1] %vm252_vm0, %v648_v58 }
  0x4e   : > { %v302_v11 = vadd.f32 %v301_v8, %v300_v1  ;;  %v346_v15 = vrot.slane %v345_v9, 4 }
  0x4f   : > { %v311_v12 = vadd.f32 %v310_v10, %v309_v5  ;;  %v338_v19 = vadd.f32 %v337_v13, %v336_v6 }
  0x50   : > { %v303_v14 = vrot.slane %v302_v11, 2  ;;  %v347_v21 = vadd.f32 %v346_v15, %v345_v9 }
  0x51   : > { %v312_v16 = vrot.slane %v311_v12, 2  ;;  %v339_v25 = vrot.slane %v338_v19, 2 }
  0x52   : > { %v304_v17 = vadd.f32 %v303_v14, %v302_v11  ;;  %v348_v26 = vrot.slane %v347_v21, 2 }
  0x53   : > { %v313_v18 = vadd.f32 %v312_v16, %v311_v12  ;;  %v340_v27 = vadd.f32 %v339_v25, %v338_v19 }
  0x54   : > { %v305_v20 = vrot.slane %v304_v17, 1  ;;  %v349_v28 = vadd.f32 %v348_v26, %v347_v21  ;;  %v352_v2 = vld [vmem:[%s247_s27] sm:$0x1] }
  0x55   : > { %v314_v22 = vrot.slane %v313_v18, 1  ;;  %v341_v31 = vrot.slane %v340_v27, 1 }
  0x56   : > { %v306_v23 = vadd.f32 %v305_v20, %v304_v17  ;;  %v350_v33 = vrot.slane %v349_v28, 1 }
  0x57   : > { %v315_v24 = vadd.f32 %v314_v22, %v313_v18  ;;  %v342_v44 = vadd.f32 %v341_v31, %v340_v27 }
  0x58   : > { %588 = vrcp.f32 %v306_v23  ;;  %vm358_vm7 = vweird.f32 %v306_v23  ;;  %v364_v34 = vand.u32 2147483648, %v306_v23  ;;  %v362_v37 = vand.u32 2147483647, %v306_v23 }
  0x59   : > { %590 = vrcp.f32 %v315_v24  ;;  %v379_v38 = vand.u32 2147483648, %v315_v24  ;;  %vm373_vm9 = vweird.f32 %v315_v24  ;;  %v377_v40 = vand.u32 2147483647, %v315_v24 }
  0x5a   : > { %v365_v42 = vor.u32 1.1754944e-38, %v364_v34  ;;  %vm363_vm12 = vcmp.eq.f32.partialorder %v362_v37, 8.507059e+37  ;;  %v351_v47 = vadd.f32 %v350_v33, %v349_v28 }
  0x5b   : > { %v380_v46 = vor.u32 1.1754944e-38, %v379_v38  ;;  %vm378_vm14 = vcmp.eq.f32.partialorder %v377_v40, 8.507059e+37 }
  0x5e   : > { %v589_v29 = vpop.eup %588 }
  0x5f   : > { %v591_v30 = vpop.eup %590  ;;  %v354_v32 = vmul.f32 %v589_v29, %v306_v23  ;;  %vm359_vm8 = vweird.f32 %v589_v29 }
  0x60   : > { %v369_v35 = vmul.f32 %v591_v30, %v315_v24  ;;  %vm374_vm10 = vweird.f32 %v591_v30  ;;  %vm360_vm11 = vmor %vm358_vm7, %vm359_vm8 }
  0x61   : > { %v355_v36 = vsub.f32 1.0, %v354_v32  ;;  %vm375_vm13 = vmor %vm373_vm9, %vm374_vm10 }
  0x62   : > { %v370_v39 = vsub.f32 1.0, %v369_v35 }
  0x63   : > { %v356_v41 = vmul.f32 %v589_v29, %v355_v36 }
  0x64   : > { %v371_v43 = vmul.f32 %v591_v30, %v370_v39 }
  0x65   : > { %v357_v45 = vadd.f32 %v589_v29, %v356_v41 }
  0x66   : > { %v372_v48 = vadd.f32 %v591_v30, %v371_v43 }
  0x67   : > { %v361_v49 = vsel %vm360_vm11, %v589_v29, %v357_v45 }
  0x68   : > { %v366_v50 = vsel %vm363_vm12, %v365_v42, %v361_v49  ;;  %v376_v51 = vsel %vm375_vm13, %v591_v30, %v372_v48 }
  0x69   : > { %v367_v52 = vmul.f32 %v366_v50, %v342_v44  ;;  %v381_v53 = vsel %vm378_vm14, %v380_v46, %v376_v51 }
  0x6a   : > { %v382_v54 = vmul.f32 %v381_v53, %v351_v47 }
  0x6b   : > { %v384_v55 = vsel %vm383_vm15, %v367_v52, 0.0 }
  0x6c   : > { %v385_v56 = vsel %vm383_vm15, %v382_v54, 0.0 }
  0x6d   : > { %v386_v57 = vadd.f32 %v385_v56, %v384_v55 }
  0x6f   : > { %387 = vadd.xlane.f32.xlu0 %v386_v57 }
  0xe2   : > { %v388_v59 = vpop.xlane.xlu0 %387 }
  0xe3   : > { %v389_v60 = vrot.slane %v388_v59, 4 }
  0xe5   : > { %v390_v61 = vadd.f32 %v389_v60, %v388_v59 }
  0xe7   : > { %v391_v62 = vrot.slane %v390_v61, 2 }
  0xe9   : > { %v392_v63 = vadd.f32 %v391_v62, %v390_v61 }
  0xeb   : > { %v393_v0 = vrot.slane %v392_v63, 1 }
  0xed   : > { %v394_v1 = vadd.f32 %v393_v0, %v392_v63 }
  0xef   : > { %517 = vpush %v394_v1 }
 0x120   : > { %s518_s28 = spop %517 }
 0x121   : > { %v396_v3 = vstv %s518_s28 }
 0x122   : > { %v397_v4 = vadd.f32 %v396_v3, %v352_v2 }
 0x124   : > { %399 = vst.msk [vmem:[%s247_s27] sm:$0x1] %vm252_vm0, %v397_v4 }
 0x125 PF: > { %s12_s15 = sadd.s32 1, %s646_s15   ;;  %s772_s9 = smov %s626_s10 }
 0x126   : > { %p9_p13 = scmp.ge.s32.totalorder %s12_s15, 6   ;;  %s773_s10 = smov %s715_s22 }
 0x127   : > { %s774_s11 = smov %s638_s13  ;;  %s775_s12 = smov %s642_s14 }
 0x128   : > { %s776_s13 = smov %s779_s16  ;;  %s777_s14 = smov %s783_s17 }
 0x129   :  { %11 = sbr.rel (!%p9_p13) target bundleno = 4 (0x4), region = 93 }

</bundles_post_ra>
